<compile_context>
chip_gen: v7x
topology: tpu7x:2x2x1
jax: 0.10.0
libtpu: 0.0.40
codegen_flags: <defaults>
</compile_context>

<pallas_src>
import functools

import numpy as np
import jax
import jax.numpy as jnp
from jax.experimental import pallas as pl
from jax.experimental.pallas import tpu as pltpu


_VMEM_TARGET = 24 * 1024 * 1024   # tile-sizing target (safe on v7x's 64 MiB physical)
_VMEM_LIMIT = 40 * 1024 * 1024    # scoped VMEM ceiling handed to Mosaic


def _round_up(x, m):
    return ((x + m - 1) // m) * m


def _itemsize(dtype):
    return np.dtype(dtype).itemsize


# ----------------------------- Pallas kernels ------------------------------

def _fused_linear_kernel(*refs, apply_ln, eps, activation, add_residual):
    """(optional LN) -> matmul -> +bias -> (optional QuickGELU) -> (optional +residual)."""
    it = iter(refs)
    x_ref = next(it)
    if apply_ln:
        g_ref = next(it)
        bt_ref = next(it)
    w_ref = next(it)
    b_ref = next(it)
    if add_residual:
        r_ref = next(it)
    o_ref = next(it)

    if apply_ln:
        x = x_ref[...].astype(jnp.float32)
        mu = jnp.mean(x, axis=-1, keepdims=True)
        xc = x - mu
        var = jnp.mean(xc * xc, axis=-1, keepdims=True)
        x = xc * jax.lax.rsqrt(var + eps)
        x = x * g_ref[...].astype(jnp.float32) + bt_ref[...].astype(jnp.float32)
        xw = x.astype(w_ref.dtype)
    else:
        # No-LN path: keep the activation in the MXU dtype (no f32 round trip).
        xw = x_ref[...]
        if xw.dtype != w_ref.dtype:
            xw = xw.astype(w_ref.dtype)

    y = jnp.dot(xw, w_ref[...], preferred_element_type=jnp.float32)
    y = y + b_ref[...].astype(jnp.float32)              # (1, tn) broadcast over rows
    if activation == "quick_gelu":
        # CLIP QuickGELU: x * sigmoid(1.702 * x)  (elementwise math kept in f32)
        y = y * jax.nn.sigmoid(1.702 * y)
    if add_residual:
        y = y + r_ref[...].astype(jnp.float32)
    o_ref[...] = y.astype(o_ref.dtype)


def _pick_tm(M, K, tn, x_bytes, w_bytes, out_bytes, res_bytes, apply_ln):
    """Largest M tile whose working set fits _VMEM_TARGET.

    Prefers a full-M tile (each weight tile then streams from HBM exactly once);
    otherwise the largest divisor of the (8-aligned) M.  Only falls back to
    padding M when M is not a multiple of 8.
    """
    fixed = 2 * K * tn * w_bytes + 2 * tn * 4 + (4 * K * 4 if apply_ln else 0)
    per_row = (2 * K * x_bytes                       # x double buffer
               + 2 * tn * out_bytes                  # output double buffer
               + (2 * tn * res_bytes if res_bytes else 0)
               + (K * 4 if apply_ln else 0)          # f32 LN temporary
               + 2 * tn * 4)                         # f32 accumulator / act temporaries
    cap = max((_VMEM_TARGET - fixed) // per_row, 8)
    Mp = _round_up(M, 8)
    if Mp <= cap:
        return Mp, Mp                                # full-M tile
    d = min(int(cap), Mp)
    d -= d % 8
    while d >= 8:
        if Mp % d == 0:
            return d, Mp
        d -= 8
    return 8, Mp                                     # unreachable: 8 | Mp always


def pallas_fused_linear(x, w, b, *, ln=None, residual=None, activation="none",
                        out_dtype=None, eps=1e-5):
    """y = act(LN(x) @ w + b) + residual.

    x:(M,K)  w:(K,N)  b:(1,N)  ln=(gamma,beta) each (1,K)  residual:(M,N).
    Tiled over (M, N); K stays resident in VMEM.  The M tile is maximized so
    the weight matrix is re-streamed as few times as possible.
    """
    M, K = x.shape
    K2, N = w.shape
    assert K == K2 and b.shape == (1, N)
    out_dtype = out_dtype if out_dtype is not None else x.dtype

    tn = next((t for t in (512, 256, 128) if N % t == 0), N)
    tm, Mp = _pick_tm(M, K, tn,
                      _itemsize(x.dtype), _itemsize(w.dtype), _itemsize(out_dtype),
                      _itemsize(residual.dtype) if residual is not None else 0,
                      ln is not None)

    if Mp != M:  # only hit when M is not already 8-aligned (callers pad S once)
        x = jnp.pad(x, ((0, Mp - M), (0, 0)))
        if residual is not None:
            residual = jnp.pad(residual, ((0, Mp - M), (0, 0)))

    in_specs = [pl.BlockSpec((tm, K), lambda i, j: (i, 0))]
    args = [x]
    if ln is not None:
        gamma, beta = ln
        in_specs += [pl.BlockSpec((1, K), lambda i, j: (0, 0)),
                     pl.BlockSpec((1, K), lambda i, j: (0, 0))]
        args += [gamma, beta]
    in_specs += [pl.BlockSpec((K, tn), lambda i, j: (0, j)),
                 pl.BlockSpec((1, tn), lambda i, j: (0, j))]
    args += [w, b]
    if residual is not None:
        in_specs.append(pl.BlockSpec((tm, tn), lambda i, j: (i, j)))
        args.append(residual)

    flops = 2 * Mp * K * N
    transcendentals = Mp * N if activation == "quick_gelu" else 0
    bytes_accessed = (Mp * K * _itemsize(x.dtype)
                      + (Mp // tm) * K * N * _itemsize(w.dtype)
                      + Mp * N * _itemsize(out_dtype)
                      + (Mp * N * _itemsize(residual.dtype) if residual is not None else 0))

    out = pl.pallas_call(
        functools.partial(_fused_linear_kernel,
                          apply_ln=ln is not None, eps=eps,
                          activation=activation,
                          add_residual=residual is not None),
        out_shape=jax.ShapeDtypeStruct((Mp, N), out_dtype),
        grid=(Mp // tm, N // tn),
        in_specs=in_specs,
        out_specs=pl.BlockSpec((tm, tn), lambda i, j: (i, j)),
        compiler_params=pltpu.CompilerParams(
            dimension_semantics=("parallel", "parallel"),
            vmem_limit_bytes=_VMEM_LIMIT),
        cost_estimate=pl.CostEstimate(flops=flops,
                                      transcendentals=transcendentals,
                                      bytes_accessed=bytes_accessed),
    )(*args)
    return out[:M] if Mp != M else out


def _embed_ln_kernel(x_ref, pos_ref, g_ref, b_ref, o_ref, *, eps):
    """Pre-LayerNorm with the position-embedding add fused in: LN(x + pos)."""
    x = x_ref[...].astype(jnp.float32) + pos_ref[...].astype(jnp.float32)
    mu = jnp.mean(x, axis=-1, keepdims=True)
    xc = x - mu
    var = jnp.mean(xc * xc, axis=-1, keepdims=True)
    y = xc * jax.lax.rsqrt(var + eps) * g_ref[...].astype(jnp.float32) \
        + b_ref[...].astype(jnp.float32)
    o_ref[...] = y.astype(o_ref.dtype)


def pallas_embed_layernorm(x, pos, gamma, beta, *, out_dtype=None, eps=1e-5):
    """x: (B, Sp, D), pos: (Sp, D), gamma/beta: (1, D).  Runs once per forward."""
    B, Sp, D = x.shape
    out_dtype = out_dtype if out_dtype is not None else x.dtype
    return pl.pallas_call(
        functools.partial(_embed_ln_kernel, eps=eps),
        out_shape=jax.ShapeDtypeStruct((B, Sp, D), out_dtype),
        grid=(B,),
        in_specs=[pl.BlockSpec((1, Sp, D), lambda b: (b, 0, 0)),
                  pl.BlockSpec((Sp, D), lambda b: (0, 0)),
                  pl.BlockSpec((1, D), lambda b: (0, 0)),
                  pl.BlockSpec((1, D), lambda b: (0, 0))],
        out_specs=pl.BlockSpec((1, Sp, D), lambda b: (b, 0, 0)),
        compiler_params=pltpu.CompilerParams(
            dimension_semantics=("parallel",),
            vmem_limit_bytes=_VMEM_LIMIT),
    )(x, pos, gamma, beta)


def _attention_kernel(q_ref, k_ref, v_ref, o_ref, *, scale, valid_len, seq_len):
    # G heads per grid step: blocks are (G, Sp, Dh)
    q = q_ref[...]
    k = k_ref[...]
    v = v_ref[...]
    s = jnp.einsum("gqd,gkd->gqk", q, k,
                   preferred_element_type=jnp.float32) * scale
    if valid_len < seq_len:
        # Padded tokens must never receive softmax weight as keys.
        kidx = jax.lax.broadcasted_iota(jnp.int32, s.shape, 2)
        s = jnp.where(kidx < valid_len, s, jnp.float32(-1e30))
    s = s - jnp.max(s, axis=-1, keepdims=True)
    p = jnp.exp(s)
    p = p * pl.reciprocal(jnp.sum(p, axis=-1, keepdims=True), approx=True)
    o = jnp.einsum("gqk,gkd->gqd", p.astype(v.dtype), v,
                   preferred_element_type=jnp.float32)
    o_ref[...] = o.astype(o_ref.dtype)


def _pick_head_group(BH, Sp, Dh):
    """Largest head group (<=8) dividing BH whose score/prob + q/k/v/o tiles fit."""
    for g in (8, 4, 2, 1):
        scores = 2 * g * Sp * Sp * 4                 # f32 scores + probs
        qkvo = 8 * g * Sp * Dh * 2                   # double-buffered bf16 q/k/v/o
        if BH % g == 0 and scores + qkvo <= _VMEM_TARGET:
            return g
    return 1


def pallas_attention(q, k, v, scale, *, valid_len, out_dtype=None):
    """Softmax attention. q,k,v: (BH, Sp, Dh). Grid parallel over head groups so
    the full (BH, Sp, Sp) score tensor is never materialized.  Sequence padding
    (valid_len < Sp) is masked inside the kernel."""
    # TODO(synk): for very long sequences, tile S with an online-softmax (flash)
    #             inner loop; unnecessary at ViT sequence lengths (S <= ~600).
    BH, Sp, Dh = q.shape
    out_dtype = out_dtype if out_dtype is not None else q.dtype
    G = _pick_head_group(BH, Sp, Dh)
    bytes_accessed = 3 * BH * Sp * Dh * _itemsize(q.dtype) + BH * Sp * Dh * _itemsize(out_dtype)
    return pl.pallas_call(
        functools.partial(_attention_kernel, scale=scale,
                          valid_len=valid_len, seq_len=Sp),
        out_shape=jax.ShapeDtypeStruct((BH, Sp, Dh), out_dtype),
        grid=(BH // G,),
        in_specs=[pl.BlockSpec((G, Sp, Dh), lambda b: (b, 0, 0)),
                  pl.BlockSpec((G, Sp, Dh), lambda b: (b, 0, 0)),
                  pl.BlockSpec((G, Sp, Dh), lambda b: (b, 0, 0))],
        out_specs=pl.BlockSpec((G, Sp, Dh), lambda b: (b, 0, 0)),
        compiler_params=pltpu.CompilerParams(
            dimension_semantics=("parallel",),
            vmem_limit_bytes=_VMEM_LIMIT),
        cost_estimate=pl.CostEstimate(flops=4 * BH * Sp * Sp * Dh,
                                      transcendentals=BH * Sp * Sp,
                                      bytes_accessed=bytes_accessed),
    )(q, k, v)


# --------------------------- parameter creation -----------------------------

def init_params(key, *, channels, patch, hidden, heads, inter, layers, num_pos):
    ks = jax.random.split(key, 8 + layers)
    std = 0.02

    def nrm(k, shape):
        return (std * jax.random.normal(k, shape, jnp.float32)).astype(jnp.float32)

    params = {
        # Conv2d(C, D, kernel=P, stride=P, bias=False) weight, PyTorch layout (D, C, P, P)
        "patch_embed_w": nrm(ks[0], (hidden, channels, patch, patch)),
        "class_embedding": nrm(ks[1], (hidden,)),
        "pos_embed": nrm(ks[2], (num_pos, hidden)),
        "pre_ln_g": jnp.ones((1, hidden), jnp.float32),
        "pre_ln_b": jnp.zeros((1, hidden), jnp.float32),
        "layers": [],
    }
    for li in range(layers):
        lk = jax.random.split(ks[8 + li], 8)
        layer = {
            "ln1_g": jnp.ones((1, hidden), jnp.float32),
            "ln1_b": jnp.zeros((1, hidden), jnp.float32),
            "q_w": nrm(lk[0], (hidden, hidden)), "q_b": jnp.zeros((1, hidden), jnp.float32),
            "k_w": nrm(lk[1], (hidden, hidden)), "k_b": jnp.zeros((1, hidden), jnp.float32),
            "v_w": nrm(lk[2], (hidden, hidden)), "v_b": jnp.zeros((1, hidden), jnp.float32),
            "o_w": nrm(lk[3], (hidden, hidden)), "o_b": jnp.zeros((1, hidden), jnp.float32),
            "ln2_g": jnp.ones((1, hidden), jnp.float32),
            "ln2_b": jnp.zeros((1, hidden), jnp.float32),
            "fc1_w": nrm(lk[4], (hidden, inter)), "fc1_b": jnp.zeros((1, inter), jnp.float32),
            "fc2_w": nrm(lk[5], (inter, hidden)), "fc2_b": jnp.zeros((1, hidden), jnp.float32),
        }
        params["layers"].append(layer)
    return params


def prepare_params(params, *, patch, compute_dtype=jnp.bfloat16):
    """One-time conversion to kernel-ready layouts/dtypes:
       * conv weight (D,C,P,P) -> (C*P*P, D) matmul weight
       * q/k/v weights fused into one (D, 3D) matmul (+ fused bias)
       * matmul weights cast to the MXU compute dtype (bf16); LN params and
         biases stay f32 (elementwise math is done in f32 inside the kernels).
    """
    D = params["class_embedding"].shape[0]
    C = params["patch_embed_w"].shape[1]
    prep = {
        "patch_embed_w": params["patch_embed_w"].reshape(D, C * patch * patch).T
                                                 .astype(compute_dtype),
        "class_embedding": params["class_embedding"],
        "pos_embed": params["pos_embed"],
        "pre_ln_g": params["pre_ln_g"], "pre_ln_b": params["pre_ln_b"],
        "layers": [],
    }
    for lp in params["layers"]:
        prep["layers"].append({
            "ln1_g": lp["ln1_g"], "ln1_b": lp["ln1_b"],
            "qkv_w": jnp.concatenate([lp["q_w"], lp["k_w"], lp["v_w"]], axis=1)
                        .astype(compute_dtype),
            "qkv_b": jnp.concatenate([lp["q_b"], lp["k_b"], lp["v_b"]], axis=1),
            "o_w": lp["o_w"].astype(compute_dtype), "o_b": lp["o_b"],
            "ln2_g": lp["ln2_g"], "ln2_b": lp["ln2_b"],
            "fc1_w": lp["fc1_w"].astype(compute_dtype), "fc1_b": lp["fc1_b"],
            "fc2_w": lp["fc2_w"].astype(compute_dtype), "fc2_b": lp["fc2_b"],
        })
    return prep


# ------------------------------ forward pass --------------------------------

def clip_vision_tower_forward(images, prep, *, patch, heads,
                              select_layer=-2, select_feature="patch",
                              compute_dtype=jnp.bfloat16):
    in_dtype = images.dtype
    B, C, H, W = images.shape
    D = prep["class_embedding"].shape[0]
    Hp, Wp = H // patch, W // patch
    Np = Hp * Wp
    S = Np + 1
    Sp = _round_up(S, 8)          # pad the token axis ONCE; padded keys masked in attention
    head_dim = D // heads
    scale = head_dim ** -0.5

    layers = prep["layers"]
    n_layers = len(layers)
    # hidden_states[k] = activation after k encoder layers (k=0 is post pre-LN).
    num_states = n_layers + 1
    sel = select_layer if select_layer >= 0 else num_states + select_layer
    assert 0 <= sel <= n_layers
    num_run = sel  # layers beyond this are never computed (select_layer=-2 skips the last)

    # --- patch embedding (Conv2d stride=patch, no bias) as a Pallas matmul ---
    x = images.astype(compute_dtype)
    xp = (x.reshape(B, C, Hp, patch, Wp, patch)
            .transpose(0, 2, 4, 1, 3, 5)
            .reshape(B * Np, C * patch * patch))                 # im2col (XLA glue, once)
    zero_b = jnp.zeros((1, D), jnp.float32)
    patch_embeds = pallas_fused_linear(xp, prep["patch_embed_w"], zero_b,
                                       out_dtype=compute_dtype).reshape(B, Np, D)

    # --- cls token concat + pad token axis once (XLA glue, runs once) ---
    cls = jnp.broadcast_to(prep["class_embedding"][None, None, :].astype(compute_dtype),
                           (B, 1, D))
    emb = jnp.concatenate([cls, patch_embeds], axis=1)           # (B, S, D)
    pos = prep["pos_embed"]                                      # (S, D), f32
    if Sp != S:
        emb = jnp.pad(emb, ((0, 0), (0, Sp - S), (0, 0)))
        pos = jnp.pad(pos, ((0, Sp - S), (0, 0)))

    # --- pre-layernorm with fused position-embedding add ---
    h = pallas_embed_layernorm(emb, pos, prep["pre_ln_g"], prep["pre_ln_b"],
                               out_dtype=compute_dtype).reshape(B * Sp, D)

    for lp in layers[:num_run]:
        # self-attention block: fused LN1 + QKV projection in one matmul kernel
        qkv = pallas_fused_linear(h, lp["qkv_w"], lp["qkv_b"],
                                  ln=(lp["ln1_g"], lp["ln1_b"]),
                                  out_dtype=compute_dtype)        # (B*Sp, 3D)
        # single relayout to (3, B*heads, Sp, Dh) instead of split + 3 transposes
        qkv3 = (qkv.reshape(B, Sp, 3, heads, head_dim)
                   .transpose(2, 0, 3, 1, 4)
                   .reshape(3, B * heads, Sp, head_dim))
        attn = pallas_attention(qkv3[0], qkv3[1], qkv3[2], scale,
                                valid_len=S, out_dtype=compute_dtype)
        attn = (attn.reshape(B, heads, Sp, head_dim)
                    .transpose(0, 2, 1, 3)
                    .reshape(B * Sp, D))
        # O-projection with the residual add fused into the kernel
        h = pallas_fused_linear(attn, lp["o_w"], lp["o_b"], residual=h,
                                out_dtype=compute_dtype)

        # MLP block: fused LN2 + fc1 + QuickGELU, then fc2 + residual
        f = pallas_fused_linear(h, lp["fc1_w"], lp["fc1_b"],
                                ln=(lp["ln2_g"], lp["ln2_b"]),
                                activation="quick_gelu", out_dtype=compute_dtype)
        h = pallas_fused_linear(f, lp["fc2_w"], lp["fc2_b"], residual=h,
                                out_dtype=compute_dtype)

    # --- feature_select (drop padded tokens, then CLS per select_feature) ---
    feats = h.reshape(B, Sp, D)
    if select_feature == "patch":
        feats = feats[:, 1:S]
    elif select_feature == "cls_patch":
        feats = feats[:, :S]
    else:
        raise ValueError(f"Unexpected select feature: {select_feature}")
    return feats.astype(in_dtype)


# ---------------------------------- main -------------------------------------

if __name__ == "__main__":
    # small synthetic CLIP ViT config
    B, C, IMG, PATCH = 2, 3, 16, 8
    HIDDEN, HEADS, INTER, LAYERS = 32, 4, 64, 3
    NUM_PATCHES = (IMG // PATCH) ** 2
    NUM_POS = NUM_PATCHES + 1

    key = jax.random.PRNGKey(0)
    k_img, k_par = jax.random.split(key)
    images = jax.random.normal(k_img, (B, C, IMG, IMG), jnp.float32)

    params = init_params(k_par, channels=C, patch=PATCH, hidden=HIDDEN,
                         heads=HEADS, inter=INTER, layers=LAYERS, num_pos=NUM_POS)
    prep = prepare_params(params, patch=PATCH, compute_dtype=jnp.bfloat16)

    feats = clip_vision_tower_forward(images, prep, patch=PATCH, heads=HEADS,
                                      select_layer=-2, select_feature="patch",
                                      compute_dtype=jnp.bfloat16)
    feats = jax.block_until_ready(feats)

    assert feats.shape == (B, NUM_PATCHES, HIDDEN), feats.shape
    assert feats.dtype == images.dtype
    assert bool(jnp.all(jnp.isfinite(feats)))
    print("KERNEL_OK")
</pallas_src>

<mosaic_0001>
module attributes {stable_mosaic.version = 11 : i64} {
  func.func @_fused_linear_kernel(%arg0: i32, %arg1: i32, %arg2: memref<8x192xbf16, #tpu.memory_space<vmem>>, %arg3: memref<192x32xbf16, #tpu.memory_space<vmem>>, %arg4: memref<1x32xf32, #tpu.memory_space<vmem>>, %arg5: memref<8x32xbf16, #tpu.memory_space<vmem>>) attributes {dimension_semantics = [#tpu.dimension_semantics<parallel>, #tpu.dimension_semantics<parallel>], iteration_bounds = array<i64: 1, 1>, scalar_prefetch = 0 : i64, scratch_operands = 0 : i64, tpu.core_type = #tpu.core_type<tc>, window_params = [{transform_indices = @transform_0, window_bounds = array<i64: 8, 192>}, {transform_indices = @transform_1, window_bounds = array<i64: 192, 32>}, {transform_indices = @transform_2, window_bounds = array<i64: 1, 32>}, {transform_indices = @transform_3, window_bounds = array<i64: 8, 32>}]} {
    %c0 = arith.constant 0 : index
    %c0_0 = arith.constant 0 : index
    %0 = vector.load %arg2[%c0, %c0_0] : memref<8x192xbf16, #tpu.memory_space<vmem>>, vector<8x192xbf16>
    %c0_1 = arith.constant 0 : index
    %c0_2 = arith.constant 0 : index
    %1 = vector.load %arg3[%c0_1, %c0_2] : memref<192x32xbf16, #tpu.memory_space<vmem>>, vector<192x32xbf16>
    %cst = arith.constant dense<0.000000e+00> : vector<8x32xf32>
    %2 = tpu.matmul %0, %1, %cst {dimension_numbers = #tpu.dot_dimension_numbers<[1], [0], [0], [1], [0, 0, 1, 1], [], []>} : vector<8x192xbf16>, vector<192x32xbf16>, vector<8x32xf32> -> vector<8x32xf32>
    %c0_3 = arith.constant 0 : index
    %c0_4 = arith.constant 0 : index
    %3 = vector.load %arg4[%c0_3, %c0_4] : memref<1x32xf32, #tpu.memory_space<vmem>>, vector<1x32xf32>
    %4 = vector.broadcast %3 : vector<1x32xf32> to vector<8x32xf32>
    %5 = arith.addf %2, %4 : vector<8x32xf32>
    %6 = arith.truncf %5 : vector<8x32xf32> to vector<8x32xbf16>
    %c0_5 = arith.constant 0 : index
    %c0_6 = arith.constant 0 : index
    %7 = vector.load %arg5[%c0_5, %c0_6] : memref<8x32xbf16, #tpu.memory_space<vmem>>, vector<8x32xbf16>
    tpu.vector_store %arg5[%c0_5, %c0_6], %6 {strides = array<i32>} : memref<8x32xbf16, #tpu.memory_space<vmem>>, vector<8x32xbf16>,
    return
  }
  func.func @transform_0(%arg0: i32, %arg1: i32) -> (i32, i32) {
    %c0_i32 = arith.constant 0 : i32
    %c0_i32_0 = arith.constant 0 : i32
    return %arg0, %c0_i32 : i32, i32
  }
  func.func @transform_1(%arg0: i32, %arg1: i32) -> (i32, i32) {
    %c0_i32 = arith.constant 0 : i32
    %c0_i32_0 = arith.constant 0 : i32
    return %c0_i32, %arg1 : i32, i32
  }
  func.func @transform_2(%arg0: i32, %arg1: i32) -> (i32, i32) {
    %c0_i32 = arith.constant 0 : i32
    %c0_i32_0 = arith.constant 0 : i32
    return %c0_i32, %arg1 : i32, i32
  }
  func.func @transform_3(%arg0: i32, %arg1: i32) -> (i32, i32) {
    %c0_i32 = arith.constant 0 : i32
    return %arg0, %arg1 : i32, i32
  }
}

</mosaic_0001>

<bundles_post_ra>
// kernel: tpu_custom_call.1
= control target key start
LH: loop header
LB: loop body
LE: loop exit
PB: predicated region body
PF: predicated region fallthrough
CT: control target
= control target key end

     0   :  { %v243_v1 = vmov 0   ;;  %vm126_vm0 = vcmask 523264   ;;  %s319_s0 = inlined_call_operand.vmem [shape: bf16[8,192], index: 0, kind: input, shape index: {}]   ;;  %s320_s1 = inlined_call_operand.vmem [shape: bf16[192,32], index: 1, kind: input, shape index: {}]   ;;  %s321_s2 = inlined_call_operand.vmem [shape: f32[1,32], index: 2, kind: input, shape index: {}]   ;;  %s322_s3 = inlined_call_operand.hbm [shape: bf16[8,32], index: 3, kind: output, shape index: {}]  }
   0x1   :  { %v205_v0 = vld [vmem:[%s320_s1] sm:$0xff]   ;;  %130 = vmatprep.subr.bf16.mxu0 %v243_v1  ;;  %v206_v2 = vld [vmem:[%s320_s1 + $0x8] sm:$0xff]   ;;  %v207_v3 = vld [vmem:[%s320_s1 + $0x10] sm:$0xff]  }
   0x2   :  { %131 = vmatpush1.bf16.msra.mxu0 %v205_v0  ;;  %v208_v4 = vld [vmem:[%s320_s1 + $0x18] sm:$0xff]   ;;  %v16_v5 = vld [vmem:[%s319_s0] sm:$0xff] }
   0x3   :  { %132 = vmatprep.subr.bf16.mxu0 %v243_v1 }
   0x6   :  { %133 = vmatpush1.bf16.msra.mxu0 %v206_v2 }
   0x7   :  { %134 = vmatprep.subr.bf16.mxu0 %v243_v1 }
   0xa   :  { %135 = vmatpush1.bf16.msra.mxu0 %v207_v3 }
   0xb   :  { %136 = vmatprep.subr.bf16.mxu0 %v243_v1 }
   0xc   :  { %8 = vsyncpa [#allocation3], 0  ;;  %v189_v6 = vcombine.high %v16_v5, %v16_v5  ;;  %v209_v7 = vld [vmem:[%s320_s1 + $0x20] sm:$0xff]   ;;  %v210_v8 = vld [vmem:[%s320_s1 + $0x28] sm:$0xff]   ;;  %v188_v15 = vcombine.low %v16_v5, %v16_v5  ;;  %s244_s12 = smov [#allocation2]   ;;  %vm171_vm1 = vcmask 257024  }
   0xd   :  { %v211_v9 = vld [vmem:[%s320_s1 + $0x30] sm:$0xff]   ;;  %v212_v10 = vld [vmem:[%s320_s1 + $0x38] sm:$0xff]   ;;  %v213_v11 = vld [vmem:[%s320_s1 + $0x40] sm:$0xff]   ;;  %s179_s13 = sshll.u32 %s244_s12, 4  ;;  %s180_s13 = int_to_ptr.vmem [resolvable:$true] %s179_s13 }
   0xe   :  { %137 = vmatpush1.bf16.msra.mxu0 %v208_v4  ;;  %202 = vmatprep.mubr.msk.bf16.mxu0 %vm126_vm0, %v189_v6  ;;  %v214_v12 = vld [vmem:[%s320_s1 + $0x48] sm:$0xff]   ;;  %v215_v13 = vld [vmem:[%s320_s1 + $0x50] sm:$0xff]   ;;  %v216_v14 = vld [vmem:[%s320_s1 + $0x58] sm:$0xff]   ;;  %s219_s1 = scalar_lea.vmem %s180_s13, 64  ;;  %p224_p1 = scmp.lt.s32.totalorder %s180_s13, %s180_s13 }
   0xf   :  { %138 = vmatprep.subr.bf16.mxu0 %v243_v1  ;;  %v187_v16 = vld [vmem:[%s321_s2] ss:$0 sm:$0xff]  ;;  %p220_p0 = scmp.ne.s32.totalorder %s180_s13, %s219_s1  ;;  %p225_p2 = scmp.lt.s32.totalorder %s219_s1, %s219_s1 }
  0x11   :  { %p226_p3 = por %p225_p2, %p224_p1 }
  0x12   :  { %139 = vmatpush1.bf16.msra.mxu0 %v209_v7 }
  0x13   :  { %140 = vmatprep.subr.bf16.mxu0 %v243_v1  ;;  %p227_p4 = pnand %p226_p3, %p220_p0 }
  0x16   :  { %141 = vmatpush1.bf16.msra.mxu0 %v210_v8 }
  0x17   :  { %142 = vmatprep.subr.bf16.mxu0 %v243_v1 }
  0x1a   :  { %143 = vmatpush1.bf16.msra.mxu0 %v211_v9 }
  0x1b   :  { %144 = vmatprep.subr.bf16.mxu0 %v243_v1 }
  0x1e   :  { %145 = vmatpush1.bf16.msra.mxu0 %v212_v10 }
  0x1f   :  { %146 = vmatprep.subr.bf16.mxu0 %v243_v1 }
  0x22   :  { %147 = vmatpush1.bf16.msra.mxu0 %v213_v11 }
  0x23   :  { %148 = vmatprep.subr.bf16.mxu0 %v243_v1 }
  0x26   :  { %149 = vmatpush1.bf16.msra.mxu0 %v214_v12 }
  0x27   :  { %150 = vmatprep.subr.bf16.mxu0 %v243_v1 }
  0x2a   :  { %151 = vmatpush1.bf16.msra.mxu0 %v215_v13 }
  0x2b   :  { %152 = vmatprep.subr.bf16.mxu0 %v243_v1 }
  0x2e   :  { %153 = vmatpush1.bf16.msra.mxu0 %v216_v14 }
  0x31   :  { %163 = vmatmul.mubr.bf16.vlgmr.msra.gmra.mrb[0].mxu0 %v188_v15 }
 0x104   :  { %v164_v17 = vpop.f32.mrb[0].mxu0 }
 0x105   :  { %v165_v18 = vadd.f32 %v187_v16, %v164_v17  ;;  %v166_v19 = vpop.f32.mrb[1].mxu0 }
 0x106   :  { %v167_v20 = vpop.f32.mrb[2].mxu0 }
 0x107   :  { %v170_v21 = vpack.c.bf16 %v165_v18, %v165_v18  ;;  %v168_v22 = vpop.f32.mrb[3].mxu0 }
 0x109   :  { %172 = vst.msk [vmem:[#allocation2] sm:$0xf] %vm171_vm1, %v170_v21 }
 0x10a   :  { %230 = shalt.err (!%p227_p4)
}
 0x10b   :  { %s231_s15 = scalar_lea.hbm %s322_s3, 64 }
 0x10c   :  { %p232_p5 = scmp.ne.s32.totalorder %s322_s3, %s231_s15  ;;  %p235_p6 = scmp.lt.u32.totalorder %s231_s15, %s322_s3 }
 0x10e   :  { %p237_p7 = pnand %p235_p6, %p232_p5 }
 0x110   :  { %240 = shalt.err (!%p237_p7)
}
 0x111   :  { %182 = dma.vmem_to_hbm [thread:$0]  %s180_s13, 64, %s322_s3, [#allocation3]  }
 0x112   :  { %241 = dma.done.wait [#allocation3], 64  }
 0x113   :  { %242 = vsyncadd [#allocation3], 4294967232 }
 0x114   :  { %186 = vsyncpa [#allocation3], 1 }

</bundles_post_ra>
